<compile_context>
chip_gen: v5e
topology: v5e:2x2
jax: 0.10.0
libtpu: 0.0.40
codegen_flags: <defaults>
</compile_context>

<pallas_src>
import functools

import jax
import jax.numpy as jnp
from jax import lax
from jax.experimental import pallas as pl
from jax.experimental.pallas import tpu as pltpu

LANE = 128
HIDDEN = 256


def _round_up(x, m):
    return ((x + m - 1) // m) * m


def _pad_axis(x, axis, target):
    pad = target - x.shape[axis]
    if pad <= 0:
        return x
    widths = [(0, 0)] * x.ndim
    widths[axis] = (0, pad)
    return jnp.pad(x, widths)


def _leaky_relu(x, slope=0.2):
    return jnp.where(x >= 0, x, slope * x)


def discriminator_kernel(feat_ref, lab_ref, w1_ref, w2_ref, wout_ref, bias_ref,
                         out_ref):
    f32 = jnp.float32
    cdt = w1_ref.dtype                       # compute dtype (bf16 or f32)
    tb = feat_ref.shape[0]                   # batch tile
    kf = feat_ref.shape[1]                   # padded feature width (mult of 128)
    nlp = w1_ref.shape[0] - kf               # padded one-hot width (mult of 128)

    # Packed bias rows (f32): [b1 | b2 | bout_pad] = [0:256 | 256:512 | 512:640]
    b1 = bias_ref[:, 0:HIDDEN]
    b2 = bias_ref[:, HIDDEN:2 * HIDDEN]
    bo = bias_ref[:, 2 * HIDDEN:2 * HIDDEN + LANE]

    # One-hot labels (embedding table is pre-folded into the label half of W1).
    iota = lax.broadcasted_iota(jnp.int32, (tb, nlp), 1)
    onehot = (iota == lab_ref[...]).astype(cdt)          # lab_ref: (tb, 1) int32

    # Fused layer-1 input: [features | onehot]; both halves are 128-lane aligned.
    x = jnp.concatenate([feat_ref[...], onehot], axis=-1)

    # Linear(F + L, 256) + LeakyReLU(0.2)   -- single MXU matmul, f32 accumulate.
    h1 = jnp.dot(x, w1_ref[...], preferred_element_type=f32) + b1
    h1 = _leaky_relu(h1).astype(cdt)

    # Linear(256, 256) + LeakyReLU(0.2)
    h2 = jnp.dot(h1, w2_ref[...], preferred_element_type=f32) + b2
    h2 = _leaky_relu(h2).astype(cdt)

    # output_head: Linear(256, 1), lane-padded to 128 -> dense store.
    out_ref[...] = jnp.dot(h2, wout_ref[...], preferred_element_type=f32) + bo


def prepare_params(params, num_features, compute_dtype=jnp.bfloat16):
    """One-time parameter preprocessing (fold embedding, fuse/pad/cast weights)."""
    F = num_features
    kf_pad = _round_up(F, LANE)

    w1 = params["w1"]                                  # (F + L, 256), f32
    w1f = _pad_axis(w1[:F, :], 0, kf_pad)              # (kf_pad, 256)
    # Fold embedding: emb @ W1_label == onehot @ (E @ W1_label)   (done in f32)
    w1l = params["emb"] @ w1[F:, :]                    # (num_labels, 256)
    nlp = _round_up(max(w1l.shape[0], LANE), LANE)
    w1l = _pad_axis(w1l, 0, nlp)                       # (nlp, 256)
    w1_fused = jnp.concatenate([w1f, w1l], axis=0).astype(compute_dtype)

    w2 = params["w2"].astype(compute_dtype)            # (256, 256)
    wout = _pad_axis(params["w3"], 1, LANE).astype(compute_dtype)   # (256, 128)
    bout = _pad_axis(params["b3"], 1, LANE)                          # (1, 128)
    bias_pack = jnp.concatenate(
        [params["b1"], params["b2"], bout], axis=1).astype(jnp.float32)  # (1, 640)

    return {
        "w1": w1_fused, "w2": w2, "wout": wout, "bias": bias_pack,
        "kf_pad": kf_pad, "nlp": nlp, "compute_dtype": compute_dtype,
    }


@functools.partial(jax.jit, static_argnames=("tb",))
def _forward_impl(feat_p, lab_p, w1, w2, wout, bias, *, tb):
    b_pad, kf_pad = feat_p.shape
    k1 = w1.shape[0]
    grid = (b_pad // tb,)
    return pl.pallas_call(
        discriminator_kernel,
        out_shape=jax.ShapeDtypeStruct((b_pad, LANE), jnp.float32),
        grid=grid,
        in_specs=[
            pl.BlockSpec((tb, kf_pad), lambda i: (i, 0)),              # features
            pl.BlockSpec((tb, 1), lambda i: (i, 0)),                   # labels
            pl.BlockSpec((k1, HIDDEN), lambda i: (0, 0)),              # fused W1
            pl.BlockSpec((HIDDEN, HIDDEN), lambda i: (0, 0)),          # W2
            pl.BlockSpec((HIDDEN, LANE), lambda i: (0, 0)),            # Wout (padded)
            pl.BlockSpec((1, 2 * HIDDEN + LANE), lambda i: (0, 0)),    # packed biases
        ],
        out_specs=pl.BlockSpec((tb, LANE), lambda i: (i, 0)),
        compiler_params=pltpu.CompilerParams(
            dimension_semantics=("parallel",)),
    )(feat_p, lab_p, w1, w2, wout, bias)


def discriminator_forward(features, labels, prep, *, tb=512):
    """features: (B, num_features) f32, labels: (B,) int. Returns validity (B, 1)."""
    B, _ = features.shape
    cdt = prep["compute_dtype"]
    kf_pad = prep["kf_pad"]

    # Batch tile: big enough to amortize weight DMA, multiple of 8 sublanes.
    TB = min(tb, _round_up(B, 8))
    B_pad = _round_up(B, TB)

    feat_p = _pad_axis(features.astype(jnp.float32), 1, kf_pad).astype(cdt)
    feat_p = _pad_axis(feat_p, 0, B_pad)
    lab_p = _pad_axis(labels.astype(jnp.int32).reshape(B, 1), 0, B_pad)

    out = _forward_impl(feat_p, lab_p, prep["w1"], prep["w2"], prep["wout"],
                        prep["bias"], tb=TB)
    return out[:B, :1]


def init_params(key, num_features, num_labels):
    """PyTorch-like init: Embedding ~ N(0,1); Linear ~ U(+-1/sqrt(fan_in))."""
    def linear(k, fan_in, fan_out):
        k1, k2 = jax.random.split(k)
        bound = 1.0 / jnp.sqrt(fan_in)
        w = jax.random.uniform(k1, (fan_in, fan_out), jnp.float32, -bound, bound)
        b = jax.random.uniform(k2, (1, fan_out), jnp.float32, -bound, bound)
        return w, b

    k = jax.random.split(key, 4)
    emb = jax.random.normal(k[0], (num_labels, num_labels), jnp.float32)
    w1, b1 = linear(k[1], num_features + num_labels, HIDDEN)
    w2, b2 = linear(k[2], HIDDEN, HIDDEN)
    w3, b3 = linear(k[3], HIDDEN, 1)
    return {"emb": emb, "w1": w1, "b1": b1, "w2": w2, "b2": b2, "w3": w3, "b3": b3}


def _reference(features, labels, params):
    """Pure-JAX reference of the PyTorch Discriminator forward (default flags)."""
    emb = params["emb"][labels]                              # embedding lookup
    x = jnp.concatenate([features, emb], axis=-1)
    h1 = x @ params["w1"] + params["b1"]
    h1 = jnp.where(h1 >= 0, h1, 0.2 * h1)
    h2 = h1 @ params["w2"] + params["b2"]
    h2 = jnp.where(h2 >= 0, h2, 0.2 * h2)
    return h2 @ params["w3"] + params["b3"]                  # validity (no sigmoid)


if __name__ == "__main__":
    num_features = 32
    num_labels = 10

    key = jax.random.PRNGKey(0)
    kp, kf, kl, kf2, kl2 = jax.random.split(key, 5)
    params = init_params(kp, num_features, num_labels)

    # --- Test 1: small batch, exact-math (f32) path -> tight tolerance ---------
    B = 8
    features = jax.random.normal(kf, (B, num_features), jnp.float32)
    labels = jax.random.randint(kl, (B,), 0, num_labels)

    prep_f32 = prepare_params(params, num_features, compute_dtype=jnp.float32)
    validity_f32 = jax.block_until_ready(
        discriminator_forward(features, labels, prep_f32))
    ref = _reference(features, labels, params)
    assert validity_f32.shape == (B, 1)
    assert jnp.allclose(validity_f32, ref, atol=1e-4, rtol=1e-4), "f32 mismatch"

    # --- Test 2: small batch, default mixed-precision (bf16 weights/activations,
    #             f32 accumulation) -> mixed-precision tolerance ----------------
    prep_bf16 = prepare_params(params, num_features, compute_dtype=jnp.bfloat16)
    validity_bf16 = jax.block_until_ready(
        discriminator_forward(features, labels, prep_bf16))
    assert validity_bf16.shape == (B, 1)
    assert jnp.allclose(validity_bf16, ref, atol=2e-2, rtol=2e-2), "bf16 mismatch"

    # --- Test 3: larger batch exercising the batch grid (multiple tiles + ragged
    #             batch padding), f32 path for an exact check -------------------
    B2 = 300
    features2 = jax.random.normal(kf2, (B2, num_features), jnp.float32)
    labels2 = jax.random.randint(kl2, (B2,), 0, num_labels)
    validity2 = jax.block_until_ready(
        discriminator_forward(features2, labels2, prep_f32, tb=128))
    ref2 = _reference(features2, labels2, params)
    assert validity2.shape == (B2, 1)
    assert jnp.allclose(validity2, ref2, atol=1e-4, rtol=1e-4), "grid mismatch"

    print("KERNEL_OK")
</pallas_src>

<mosaic_0001>
module attributes {stable_mosaic.version = 11 : i64} {
  func.func @discriminator_kernel(%arg0: i32, %arg1: memref<8x128xf32, #tpu.memory_space<vmem>>, %arg2: memref<8x1xi32, #tpu.memory_space<vmem>>, %arg3: memref<256x256xf32, #tpu.memory_space<vmem>>, %arg4: memref<256x256xf32, #tpu.memory_space<vmem>>, %arg5: memref<256x128xf32, #tpu.memory_space<vmem>>, %arg6: memref<1x640xf32, #tpu.memory_space<vmem>>, %arg7: memref<8x128xf32, #tpu.memory_space<vmem>>) attributes {dimension_semantics = [#tpu.dimension_semantics<parallel>], iteration_bounds = array<i64: 1>, scalar_prefetch = 0 : i64, scratch_operands = 0 : i64, tpu.core_type = #tpu.core_type<tc>, window_params = [{transform_indices = @transform_0, window_bounds = array<i64: 8, 128>}, {transform_indices = @transform_1, window_bounds = array<i64: 8, 1>}, {pipeline_mode = #tpu.pipeline_mode<synchronous>, transform_indices = @transform_2, window_bounds = array<i64: 256, 256>}, {pipeline_mode = #tpu.pipeline_mode<synchronous>, transform_indices = @transform_3, window_bounds = array<i64: 256, 256>}, {pipeline_mode = #tpu.pipeline_mode<synchronous>, transform_indices = @transform_4, window_bounds = array<i64: 256, 128>}, {pipeline_mode = #tpu.pipeline_mode<synchronous>, transform_indices = @transform_5, window_bounds = array<i64: 1, 640>}, {transform_indices = @transform_6, window_bounds = array<i64: 8, 128>}]} {
    %c0 = arith.constant 0 : index
    %c0_0 = arith.constant 0 : index
    %0 = vector.load %arg6[%c0, %c0_0] : memref<1x640xf32, #tpu.memory_space<vmem>>, vector<1x256xf32>
    %c0_1 = arith.constant 0 : index
    %c256 = arith.constant 256 : index
    %1 = vector.load %arg6[%c0_1, %c256] : memref<1x640xf32, #tpu.memory_space<vmem>>, vector<1x256xf32>
    %c0_2 = arith.constant 0 : index
    %c512 = arith.constant 512 : index
    %2 = vector.load %arg6[%c0_2, %c512] : memref<1x640xf32, #tpu.memory_space<vmem>>, vector<1x128xf32>
    %3 = tpu.iota {dimensions = array<i32: 1>} : vector<8x128xi32>
    %c0_3 = arith.constant 0 : index
    %c0_4 = arith.constant 0 : index
    %4 = vector.load %arg2[%c0_3, %c0_4] : memref<8x1xi32, #tpu.memory_space<vmem>>, vector<8x1xi32>
    %5 = vector.broadcast %4 : vector<8x1xi32> to vector<8x128xi32>
    %6 = arith.cmpi eq, %3, %5 : vector<8x128xi32>
    %7 = arith.extui %6 : vector<8x128xi1> to vector<8x128xi32>
    %8 = arith.sitofp %7 : vector<8x128xi32> to vector<8x128xf32>
    %c0_5 = arith.constant 0 : index
    %c0_6 = arith.constant 0 : index
    %9 = vector.load %arg1[%c0_5, %c0_6] : memref<8x128xf32, #tpu.memory_space<vmem>>, vector<8x128xf32>
    %10 = tpu.concatenate %9, %8 in 1 : vector<8x128xf32>, vector<8x128xf32> -> vector<8x256xf32>
    %c0_7 = arith.constant 0 : index
    %c0_8 = arith.constant 0 : index
    %11 = vector.load %arg3[%c0_7, %c0_8] : memref<256x256xf32, #tpu.memory_space<vmem>>, vector<256x256xf32>
    %cst = arith.constant dense<0.000000e+00> : vector<8x256xf32>
    %12 = tpu.matmul %10, %11, %cst {dimension_numbers = #tpu.dot_dimension_numbers<[1], [0], [0], [1], [0, 0, 1, 1], [], []>} : vector<8x256xf32>, vector<256x256xf32>, vector<8x256xf32> -> vector<8x256xf32>
    %13 = vector.broadcast %0 : vector<1x256xf32> to vector<8x256xf32>
    %14 = arith.addf %12, %13 : vector<8x256xf32>
    %cst_9 = arith.constant 0.000000e+00 : f32
    %15 = vector.broadcast %cst_9 : f32 to vector<8x256xf32>
    %16 = arith.cmpf oge, %14, %15 : vector<8x256xf32>
    %cst_10 = arith.constant 2.000000e-01 : f32
    %17 = vector.broadcast %cst_10 : f32 to vector<8x256xf32>
    %18 = arith.mulf %17, %14 : vector<8x256xf32>
    %19 = arith.select %16, %14, %18 : vector<8x256xi1>, vector<8x256xf32>
    %c0_11 = arith.constant 0 : index
    %c0_12 = arith.constant 0 : index
    %20 = vector.load %arg4[%c0_11, %c0_12] : memref<256x256xf32, #tpu.memory_space<vmem>>, vector<256x256xf32>
    %cst_13 = arith.constant dense<0.000000e+00> : vector<8x256xf32>
    %21 = tpu.matmul %19, %20, %cst_13 {dimension_numbers = #tpu.dot_dimension_numbers<[1], [0], [0], [1], [0, 0, 1, 1], [], []>} : vector<8x256xf32>, vector<256x256xf32>, vector<8x256xf32> -> vector<8x256xf32>
    %22 = vector.broadcast %1 : vector<1x256xf32> to vector<8x256xf32>
    %23 = arith.addf %21, %22 : vector<8x256xf32>
    %cst_14 = arith.constant 0.000000e+00 : f32
    %24 = vector.broadcast %cst_14 : f32 to vector<8x256xf32>
    %25 = arith.cmpf oge, %23, %24 : vector<8x256xf32>
    %cst_15 = arith.constant 2.000000e-01 : f32
    %26 = vector.broadcast %cst_15 : f32 to vector<8x256xf32>
    %27 = arith.mulf %26, %23 : vector<8x256xf32>
    %28 = arith.select %25, %23, %27 : vector<8x256xi1>, vector<8x256xf32>
    %c0_16 = arith.constant 0 : index
    %c0_17 = arith.constant 0 : index
    %29 = vector.load %arg5[%c0_16, %c0_17] : memref<256x128xf32, #tpu.memory_space<vmem>>, vector<256x128xf32>
    %cst_18 = arith.constant dense<0.000000e+00> : vector<8x128xf32>
    %30 = tpu.matmul %28, %29, %cst_18 {dimension_numbers = #tpu.dot_dimension_numbers<[1], [0], [0], [1], [0, 0, 1, 1], [], []>} : vector<8x256xf32>, vector<256x128xf32>, vector<8x128xf32> -> vector<8x128xf32>
    %31 = vector.broadcast %2 : vector<1x128xf32> to vector<8x128xf32>
    %32 = arith.addf %30, %31 : vector<8x128xf32>
    %c0_19 = arith.constant 0 : index
    %c0_20 = arith.constant 0 : index
    %33 = vector.load %arg7[%c0_19, %c0_20] : memref<8x128xf32, #tpu.memory_space<vmem>>, vector<8x128xf32>
    tpu.vector_store %arg7[%c0_19, %c0_20], %32 {strides = array<i32>} : memref<8x128xf32, #tpu.memory_space<vmem>>, vector<8x128xf32>,
    return
  }
  func.func @transform_0(%arg0: i32) -> (i32, i32) {
    %c0_i32 = arith.constant 0 : i32
    %c0_i32_0 = arith.constant 0 : i32
    return %arg0, %c0_i32 : i32, i32
  }
  func.func @transform_1(%arg0: i32) -> (i32, i32) {
    %c0_i32 = arith.constant 0 : i32
    %c0_i32_0 = arith.constant 0 : i32
    return %arg0, %c0_i32 : i32, i32
  }
  func.func @transform_2(%arg0: i32) -> (i32, i32) {
    %c0_i32 = arith.constant 0 : i32
    %c0_i32_0 = arith.constant 0 : i32
    %c0_i32_1 = arith.constant 0 : i32
    return %c0_i32, %c0_i32_0 : i32, i32
  }
  func.func @transform_3(%arg0: i32) -> (i32, i32) {
    %c0_i32 = arith.constant 0 : i32
    %c0_i32_0 = arith.constant 0 : i32
    %c0_i32_1 = arith.constant 0 : i32
    return %c0_i32, %c0_i32_0 : i32, i32
  }
  func.func @transform_4(%arg0: i32) -> (i32, i32) {
    %c0_i32 = arith.constant 0 : i32
    %c0_i32_0 = arith.constant 0 : i32
    %c0_i32_1 = arith.constant 0 : i32
    return %c0_i32, %c0_i32_0 : i32, i32
  }
  func.func @transform_5(%arg0: i32) -> (i32, i32) {
    %c0_i32 = arith.constant 0 : i32
    %c0_i32_0 = arith.constant 0 : i32
    %c0_i32_1 = arith.constant 0 : i32
    return %c0_i32, %c0_i32_0 : i32, i32
  }
  func.func @transform_6(%arg0: i32) -> (i32, i32) {
    %c0_i32 = arith.constant 0 : i32
    %c0_i32_0 = arith.constant 0 : i32
    return %arg0, %c0_i32 : i32, i32
  }
}

</mosaic_0001>

<bundles_post_ra>
// kernel: _forward_impl.1
= control target key start
LH: loop header
LB: loop body
LE: loop exit
PB: predicated region body
PF: predicated region fallthrough
CT: control target
= control target key end

     0   :  { %11 = vsyncpa [#allocation3], 0  ;;  %s677_s0 = inlined_call_operand.vmem [shape: f32[8,128], index: 0, kind: input, shape index: {}]   ;;  %s678_s1 = inlined_call_operand.vmem [shape: s32[8,1], index: 1, kind: input, shape index: {}]   ;;  %s679_s2 = inlined_call_operand.hbm [shape: f32[256,256], index: 2, kind: input, shape index: {}]   ;;  %s680_s3 = inlined_call_operand.hbm [shape: f32[256,256], index: 3, kind: input, shape index: {}]   ;;  %s681_s4 = inlined_call_operand.hbm [shape: f32[256,128], index: 4, kind: input, shape index: {}]   ;;  %s682_s5 = inlined_call_operand.vmem [shape: f32[1,640], index: 5, kind: input, shape index: {}]   ;;  %s683_s6 = inlined_call_operand.hbm [shape: f32[8,128], index: 6, kind: output, shape index: {}]  }
   0x1   :  { %12 = vsyncpa [#allocation6], 0 }
   0x2   :  { %13 = vsyncpa [#allocation4], 0  ;;  %s35_s23 = sshll.u32 %s680_s3, 4  ;;  %s605_s24 = smov [#allocation5]   ;;  %s36_s23 = int_to_ptr.hbm [resolvable:$true] %s35_s23 }
   0x3   :  { %s37_s25 = sshll.u32 %s605_s24, 4  ;;  %s22_s28 = sshll.u32 %s679_s2, 4  ;;  %s38_s25 = int_to_ptr.vmem [resolvable:$true] %s37_s25  ;;  %s23_s28 = int_to_ptr.hbm [resolvable:$true] %s22_s28 }
   0x4   :  { %s606_s29 = smov 256   ;;  %s607_s30 = smov 16  }
   0x5   :  { %43 = dma.hbm_to_vmem [thread:$0]  %s36_s23, 8192, %s38_s25, [#allocation6], %s606_s29, %s606_s29, %s607_s30  }
   0x6   :  { %s608_s7 = smov [#allocation2]   ;;  %s48_s11 = sshll.u32 %s681_s4, 4  ;;  %s49_s11 = int_to_ptr.hbm [resolvable:$true] %s48_s11 }
   0x7   :  { %s24_s8 = sshll.u32 %s608_s7, 4  ;;  %s609_s3 = smov [#allocation7]   ;;  %s25_s8 = int_to_ptr.vmem [resolvable:$true] %s24_s8 }
   0x8   :  { %30 = dma.hbm_to_vmem [thread:$0]  %s23_s28, 8192, %s25_s8, [#allocation3], %s606_s29, %s606_s29, %s607_s30  }
   0x9   :  { %s50_s12 = sshll.u32 %s609_s3, 4  ;;  %s610_s13 = smov 128   ;;  %s51_s12 = int_to_ptr.vmem [resolvable:$true] %s50_s12 }
   0xa   :  { %s611_s14 = smov 8  }
   0xb   :  { %56 = dma.hbm_to_vmem [thread:$0]  %s49_s11, 4096, %s51_s12, [#allocation6], %s610_s13, %s610_s13, %s611_s14  }
   0xc   :  { %599 = dma.done.wait [#allocation3], 8192  }
   0xd   :  { %600 = vsyncadd [#allocation3], 4294959104 }
   0xe   :  { %601 = dma.done.wait [#allocation6], 12288  }
   0xf   :  { %602 = vsyncadd [#allocation6], 4294955008  ;;  %v612_v0 = vmov 0   ;;  %v76_v1 = vld [vmem:[%s678_s1] sm:$0xff]  ;;  %v114_v2 = vld [vmem:[#allocation2 + $0xf0] sm:$0xff]  ;;  %s614_s21 = smov [#allocation8]  }
  0x10   :  { %501 = vset.pattern.permute.xlu0 %v612_v0  ;;  %v115_v3 = vld [vmem:[#allocation2 + $0xf8] sm:$0xff]  ;;  %153 = vmatpush.msra.mxu0 %v114_v2  ;;  %v112_v4 = vld [vmem:[#allocation2 + $0xe0] sm:$0xff]  ;;  %v146_v5 = vld [vmem:[#allocation2 + $0x1f0] sm:$0xff]  ;;  %s475_s22 = sshll.u32 %s614_s21, 4  ;;  %s477_s25 = sshll.u32 %s683_s6, 4  ;;  %s476_s22 = int_to_ptr.vmem [resolvable:$true] %s475_s22  ;;  %s478_s25 = int_to_ptr.hbm [resolvable:$true] %s477_s25 }
  0x11   :  { %78 = vperm.xlu0 %501, %v76_v1   ;;  %v113_v6 = vld [vmem:[#allocation2 + $0xe8] sm:$0xff]  ;;  %193 = vmatpush.msra.mxu2 %v115_v3  ;;  %v147_v7 = vld [vmem:[#allocation2 + $0x1f8] sm:$0xff]  ;;  %v110_v8 = vld [vmem:[#allocation2 + $0xd0] sm:$0xff] }
  0x12   :  { %173 = vmatpush.msra.mxu1 %v146_v5  ;;  %v144_v9 = vld [vmem:[#allocation2 + $0x1e0] sm:$0xff]  ;;  %154 = vmatpush.msra.mxu0 %v112_v4  ;;  %v111_v10 = vld [vmem:[#allocation2 + $0xd8] sm:$0xff]  ;;  %v145_v11 = vld [vmem:[#allocation2 + $0x1e8] sm:$0xff] }
  0x13   :  { %213 = vmatpush.msra.mxu3 %v147_v7  ;;  %194 = vmatpush.msra.mxu2 %v113_v6  ;;  %v108_v12 = vld [vmem:[#allocation2 + $0xc0] sm:$0xff]  ;;  %v142_v13 = vld [vmem:[#allocation2 + $0x1d0] sm:$0xff]  ;;  %v143_v14 = vld [vmem:[#allocation2 + $0x1d8] sm:$0xff] }
  0x14   :  { %174 = vmatpush.msra.mxu1 %v144_v9  ;;  %155 = vmatpush.msra.mxu0 %v110_v8  ;;  %v109_v15 = vld [vmem:[#allocation2 + $0xc8] sm:$0xff]  ;;  %v140_v16 = vld [vmem:[#allocation2 + $0x1c0] sm:$0xff]  ;;  %v106_v17 = vld [vmem:[#allocation2 + $0xb0] sm:$0xff] }
  0x15   :  { %214 = vmatpush.msra.mxu3 %v145_v11  ;;  %195 = vmatpush.msra.mxu2 %v111_v10  ;;  %v141_v18 = vld [vmem:[#allocation2 + $0x1c8] sm:$0xff]  ;;  %v107_v19 = vld [vmem:[#allocation2 + $0xb8] sm:$0xff]  ;;  %v138_v20 = vld [vmem:[#allocation2 + $0x1b0] sm:$0xff] }
  0x16   :  { %175 = vmatpush.msra.mxu1 %v142_v13  ;;  %156 = vmatpush.msra.mxu0 %v108_v12  ;;  %v104_v21 = vld [vmem:[#allocation2 + $0xa0] sm:$0xff]  ;;  %v139_v22 = vld [vmem:[#allocation2 + $0x1b8] sm:$0xff]  ;;  %v105_v23 = vld [vmem:[#allocation2 + $0xa8] sm:$0xff] }
  0x17   :  { %215 = vmatpush.msra.mxu3 %v143_v14  ;;  %196 = vmatpush.msra.mxu2 %v109_v15  ;;  %v136_v24 = vld [vmem:[#allocation2 + $0x1a0] sm:$0xff]  ;;  %v102_v25 = vld [vmem:[#allocation2 + $0x90] sm:$0xff]  ;;  %v137_v26 = vld [vmem:[#allocation2 + $0x1a8] sm:$0xff] }
  0x18   :  { %176 = vmatpush.msra.mxu1 %v140_v16  ;;  %157 = vmatpush.msra.mxu0 %v106_v17  ;;  %v103_v27 = vld [vmem:[#allocation2 + $0x98] sm:$0xff]  ;;  %v134_v28 = vld [vmem:[#allocation2 + $0x190] sm:$0xff]  ;;  %v100_v29 = vld [vmem:[#allocation2 + $0x80] sm:$0xff] }
  0x19   :  { %216 = vmatpush.msra.mxu3 %v141_v18  ;;  %197 = vmatpush.msra.mxu2 %v107_v19  ;;  %v135_v30 = vld [vmem:[#allocation2 + $0x198] sm:$0xff]  ;;  %v101_v31 = vld [vmem:[#allocation2 + $0x88] sm:$0xff]  ;;  %v132_v32 = vld [vmem:[#allocation2 + $0x180] sm:$0xff] }
  0x1a   :  { %177 = vmatpush.msra.mxu1 %v138_v20  ;;  %158 = vmatpush.msra.mxu0 %v104_v21  ;;  %v98_v33 = vld [vmem:[#allocation2 + $0x70] sm:$0xff]  ;;  %v133_v34 = vld [vmem:[#allocation2 + $0x188] sm:$0xff]  ;;  %v99_v35 = vld [vmem:[#allocation2 + $0x78] sm:$0xff] }
  0x1b   :  { %217 = vmatpush.msra.mxu3 %v139_v22  ;;  %198 = vmatpush.msra.mxu2 %v105_v23  ;;  %v130_v36 = vld [vmem:[#allocation2 + $0x170] sm:$0xff]  ;;  %v96_v37 = vld [vmem:[#allocation2 + $0x60] sm:$0xff]  ;;  %v131_v38 = vld [vmem:[#allocation2 + $0x178] sm:$0xff] }
  0x1c   :  { %178 = vmatpush.msra.mxu1 %v136_v24  ;;  %159 = vmatpush.msra.mxu0 %v102_v25  ;;  %v97_v39 = vld [vmem:[#allocation2 + $0x68] sm:$0xff]  ;;  %v128_v40 = vld [vmem:[#allocation2 + $0x160] sm:$0xff]  ;;  %v94_v41 = vld [vmem:[#allocation2 + $0x50] sm:$0xff] }
  0x1d   :  { %218 = vmatpush.msra.mxu3 %v137_v26  ;;  %199 = vmatpush.msra.mxu2 %v103_v27  ;;  %v129_v42 = vld [vmem:[#allocation2 + $0x168] sm:$0xff]  ;;  %v95_v43 = vld [vmem:[#allocation2 + $0x58] sm:$0xff]  ;;  %v126_v44 = vld [vmem:[#allocation2 + $0x150] sm:$0xff] }
  0x1e   :  { %179 = vmatpush.msra.mxu1 %v134_v28  ;;  %160 = vmatpush.msra.mxu0 %v100_v29  ;;  %v92_v45 = vld [vmem:[#allocation2 + $0x40] sm:$0xff]  ;;  %v127_v46 = vld [vmem:[#allocation2 + $0x158] sm:$0xff]  ;;  %v93_v47 = vld [vmem:[#allocation2 + $0x48] sm:$0xff] }
  0x1f   :  { %219 = vmatpush.msra.mxu3 %v135_v30  ;;  %200 = vmatpush.msra.mxu2 %v101_v31  ;;  %v124_v48 = vld [vmem:[#allocation2 + $0x140] sm:$0xff]  ;;  %v90_v49 = vld [vmem:[#allocation2 + $0x30] sm:$0xff]  ;;  %v125_v50 = vld [vmem:[#allocation2 + $0x148] sm:$0xff] }
  0x20   :  { %180 = vmatpush.msra.mxu1 %v132_v32  ;;  %161 = vmatpush.msra.mxu0 %v98_v33  ;;  %v91_v51 = vld [vmem:[#allocation2 + $0x38] sm:$0xff]  ;;  %v122_v52 = vld [vmem:[#allocation2 + $0x130] sm:$0xff]  ;;  %v88_v53 = vld [vmem:[#allocation2 + $0x20] sm:$0xff] }
  0x21   :  { %220 = vmatpush.msra.mxu3 %v133_v34  ;;  %201 = vmatpush.msra.mxu2 %v99_v35  ;;  %v123_v54 = vld [vmem:[#allocation2 + $0x138] sm:$0xff]  ;;  %v89_v55 = vld [vmem:[#allocation2 + $0x28] sm:$0xff]  ;;  %v120_v56 = vld [vmem:[#allocation2 + $0x120] sm:$0xff] }
  0x22   :  { %181 = vmatpush.msra.mxu1 %v130_v36  ;;  %162 = vmatpush.msra.mxu0 %v96_v37  ;;  %v86_v57 = vld [vmem:[#allocation2 + $0x10] sm:$0xff]  ;;  %v121_v58 = vld [vmem:[#allocation2 + $0x128] sm:$0xff]  ;;  %v87_v59 = vld [vmem:[#allocation2 + $0x18] sm:$0xff] }
  0x23   :  { %221 = vmatpush.msra.mxu3 %v131_v38  ;;  %202 = vmatpush.msra.mxu2 %v97_v39  ;;  %v118_v60 = vld [vmem:[#allocation2 + $0x110] sm:$0xff]  ;;  %v84_v61 = vld [vmem:[#allocation2] sm:$0xff]  ;;  %v119_v62 = vld [vmem:[#allocation2 + $0x118] sm:$0xff] }
  0x24   :  { %182 = vmatpush.msra.mxu1 %v128_v40  ;;  %163 = vmatpush.msra.mxu0 %v94_v41  ;;  %v85_v63 = vld [vmem:[#allocation2 + $0x8] sm:$0xff]  ;;  %v83_v0 = vld [vmem:[%s677_s0] sm:$0xff]  ;;  %v269_v3 = vld [vmem:[#allocation5 + $0xf0] sm:$0xff] }
  0x25   :  { %222 = vmatpush.msra.mxu3 %v129_v42  ;;  %203 = vmatpush.msra.mxu2 %v95_v43  ;;  %v116_v1 = vld [vmem:[#allocation2 + $0x100] sm:$0xff]  ;;  %v117_v2 = vld [vmem:[#allocation2 + $0x108] sm:$0xff]  ;;  %v270_v4 = vld [vmem:[#allocation5 + $0xf8] sm:$0xff] }
  0x26   :  { %183 = vmatpush.msra.mxu1 %v126_v44  ;;  %164 = vmatpush.msra.mxu0 %v92_v45  ;;  %v267_v5 = vld [vmem:[#allocation5 + $0xe0] sm:$0xff]  ;;  %v268_v6 = vld [vmem:[#allocation5 + $0xe8] sm:$0xff]  ;;  %v265_v7 = vld [vmem:[#allocation5 + $0xd0] sm:$0xff]  ;;  %v74_v45 = vlaneseq }
  0x27   :  { %223 = vmatpush.msra.mxu3 %v127_v46  ;;  %204 = vmatpush.msra.mxu2 %v93_v47  ;;  %v266_v8 = vld [vmem:[#allocation5 + $0xd8] sm:$0xff]  ;;  %v301_v9 = vld [vmem:[#allocation5 + $0x1f0] sm:$0xff]  ;;  %v299_v11 = vld [vmem:[#allocation5 + $0x1e0] sm:$0xff] }
  0x28   :  { %184 = vmatpush.msra.mxu1 %v124_v48  ;;  %165 = vmatpush.msra.mxu0 %v90_v49  ;;  %v302_v10 = vld [vmem:[#allocation5 + $0x1f8] sm:$0xff]  ;;  %v263_v12 = vld [vmem:[#allocation5 + $0xc0] sm:$0xff]  ;;  %v264_v13 = vld [vmem:[#allocation5 + $0xc8] sm:$0xff]  ;;  %v75_v46 = vand.u32 127, %v74_v45  ;;  %v613_v48 = vmov 1.0  }
  0x29   :  { %224 = vmatpush.msra.mxu3 %v125_v50  ;;  %205 = vmatpush.msra.mxu2 %v91_v51  ;;  %v300_v14 = vld [vmem:[#allocation5 + $0x1e8] sm:$0xff]  ;;  %v297_v15 = vld [vmem:[#allocation5 + $0x1d0] sm:$0xff]  ;;  %v298_v16 = vld [vmem:[#allocation5 + $0x1d8] sm:$0xff] }
  0x2a   :  { %185 = vmatpush.msra.mxu1 %v122_v52  ;;  %166 = vmatpush.msra.mxu0 %v88_v53  ;;  %v261_v17 = vld [vmem:[#allocation5 + $0xb0] sm:$0xff]  ;;  %v262_v18 = vld [vmem:[#allocation5 + $0xb8] sm:$0xff]  ;;  %v295_v19 = vld [vmem:[#allocation5 + $0x1c0] sm:$0xff] }
  0x2b   :  { %225 = vmatpush.msra.mxu3 %v123_v54  ;;  %206 = vmatpush.msra.mxu2 %v89_v55  ;;  %v296_v20 = vld [vmem:[#allocation5 + $0x1c8] sm:$0xff]  ;;  %v259_v21 = vld [vmem:[#allocation5 + $0xa0] sm:$0xff]  ;;  %v293_v23 = vld [vmem:[#allocation5 + $0x1b0] sm:$0xff] }
  0x2c   :  { %186 = vmatpush.msra.mxu1 %v120_v56  ;;  %167 = vmatpush.msra.mxu0 %v86_v57  ;;  %v260_v22 = vld [vmem:[#allocation5 + $0xa8] sm:$0xff]  ;;  %v294_v24 = vld [vmem:[#allocation5 + $0x1b8] sm:$0xff]  ;;  %v257_v25 = vld [vmem:[#allocation5 + $0x90] sm:$0xff] }
  0x2d   :  { %226 = vmatpush.msra.mxu3 %v121_v58  ;;  %207 = vmatpush.msra.mxu2 %v87_v59  ;;  %v258_v26 = vld [vmem:[#allocation5 + $0x98] sm:$0xff]  ;;  %v291_v27 = vld [vmem:[#allocation5 + $0x1a0] sm:$0xff]  ;;  %v292_v28 = vld [vmem:[#allocation5 + $0x1a8] sm:$0xff] }
  0x2e   :  { %187 = vmatpush.msra.mxu1 %v118_v60  ;;  %168 = vmatpush.msra.mxu0 %v84_v61  ;;  %v255_v29 = vld [vmem:[#allocation5 + $0x80] sm:$0xff]  ;;  %v256_v30 = vld [vmem:[#allocation5 + $0x88] sm:$0xff]  ;;  %v289_v31 = vld [vmem:[#allocation5 + $0x190] sm:$0xff] }
  0x2f   :  { %227 = vmatpush.msra.mxu3 %v119_v62  ;;  %208 = vmatpush.msra.mxu2 %v85_v63  ;;  %v290_v32 = vld [vmem:[#allocation5 + $0x198] sm:$0xff]  ;;  %v253_v33 = vld [vmem:[#allocation5 + $0x70] sm:$0xff]  ;;  %v287_v35 = vld [vmem:[#allocation5 + $0x180] sm:$0xff] }
  0x30   :  { %169 = vmatmul.f32.vlgmr.msra.gmra.mxu0 %v83_v0  ;;  %209 = vmatmul.f32.vlgmr.msra.gmra.mxu2 %v83_v0  ;;  %v254_v34 = vld [vmem:[#allocation5 + $0x78] sm:$0xff]  ;;  %v288_v36 = vld [vmem:[#allocation5 + $0x188] sm:$0xff]  ;;  %v251_v37 = vld [vmem:[#allocation5 + $0x60] sm:$0xff] }
  0x31   :  { %188 = vmatpush.msra.mxu1 %v116_v1  ;;  %228 = vmatpush.msra.mxu3 %v117_v2  ;;  %v252_v38 = vld [vmem:[#allocation5 + $0x68] sm:$0xff]  ;;  %v285_v39 = vld [vmem:[#allocation5 + $0x170] sm:$0xff]  ;;  %v286_v40 = vld [vmem:[#allocation5 + $0x178] sm:$0xff] }
  0x32   :  { %308 = vmatpush.msrb.mxu0 %v269_v3  ;;  %348 = vmatpush.msrb.mxu2 %v270_v4  ;;  %v249_v41 = vld [vmem:[#allocation5 + $0x50] sm:$0xff]  ;;  %v250_v42 = vld [vmem:[#allocation5 + $0x58] sm:$0xff]  ;;  %v247_v43 = vld [vmem:[#allocation5 + $0x40] sm:$0xff] }
  0x33   :  { %328 = vmatpush.msrb.mxu1 %v301_v9  ;;  %368 = vmatpush.msrb.mxu3 %v302_v10  ;;  %v248_v44 = vld [vmem:[#allocation5 + $0x48] sm:$0xff]  ;;  %v245_v49 = vld [vmem:[#allocation5 + $0x30] sm:$0xff]  ;;  %v283_v50 = vld [vmem:[#allocation5 + $0x160] sm:$0xff] }
  0x34   :  { %309 = vmatpush.msrb.mxu0 %v267_v5  ;;  %349 = vmatpush.msrb.mxu2 %v268_v6  ;;  %v246_v51 = vld [vmem:[#allocation5 + $0x38] sm:$0xff]  ;;  %v284_v52 = vld [vmem:[#allocation5 + $0x168] sm:$0xff]  ;;  %v243_v53 = vld [vmem:[#allocation5 + $0x20] sm:$0xff] }
  0x35   :  { %329 = vmatpush.msrb.mxu1 %v299_v11  ;;  %369 = vmatpush.msrb.mxu3 %v300_v14  ;;  %v281_v54 = vld [vmem:[#allocation5 + $0x150] sm:$0xff]  ;;  %v244_v55 = vld [vmem:[#allocation5 + $0x28] sm:$0xff]  ;;  %v282_v56 = vld [vmem:[#allocation5 + $0x158] sm:$0xff] }
  0x36   :  { %310 = vmatpush.msrb.mxu0 %v265_v7  ;;  %350 = vmatpush.msrb.mxu2 %v266_v8  ;;  %v241_v57 = vld [vmem:[#allocation5 + $0x10] sm:$0xff]  ;;  %v279_v58 = vld [vmem:[#allocation5 + $0x140] sm:$0xff]  ;;  %v242_v59 = vld [vmem:[#allocation5 + $0x18] sm:$0xff] }
  0x37   :  { %330 = vmatpush.msrb.mxu1 %v297_v15  ;;  %370 = vmatpush.msrb.mxu3 %v298_v16  ;;  %v280_v60 = vld [vmem:[#allocation5 + $0x148] sm:$0xff]  ;;  %v239_v61 = vld [vmem:[#allocation5] sm:$0xff]  ;;  %v277_v62 = vld [vmem:[#allocation5 + $0x130] sm:$0xff] }
  0x38   :  { %311 = vmatpush.msrb.mxu0 %v263_v12  ;;  %351 = vmatpush.msrb.mxu2 %v264_v13  ;;  %v240_v63 = vld [vmem:[#allocation5 + $0x8] sm:$0xff]  ;;  %v278_v0 = vld [vmem:[#allocation5 + $0x138] sm:$0xff]  ;;  %v275_v1 = vld [vmem:[#allocation5 + $0x120] sm:$0xff] }
  0x39   :  { %331 = vmatpush.msrb.mxu1 %v295_v19  ;;  %371 = vmatpush.msrb.mxu3 %v296_v20  ;;  %v276_v2 = vld [vmem:[#allocation5 + $0x128] sm:$0xff]  ;;  %v273_v3 = vld [vmem:[#allocation5 + $0x110] sm:$0xff]  ;;  %v274_v4 = vld [vmem:[#allocation5 + $0x118] sm:$0xff] }
  0x3a   :  { %312 = vmatpush.msrb.mxu0 %v261_v17  ;;  %352 = vmatpush.msrb.mxu2 %v262_v18  ;;  %v271_v5 = vld [vmem:[#allocation5 + $0x100] sm:$0xff]  ;;  %v272_v6 = vld [vmem:[#allocation5 + $0x108] sm:$0xff]  ;;  %v409_v7 = vld [vmem:[#allocation7 + $0x78] sm:$0xff] }
  0x3b   :  { %332 = vmatpush.msrb.mxu1 %v293_v23  ;;  %372 = vmatpush.msrb.mxu3 %v294_v24  ;;  %v408_v8 = vld [vmem:[#allocation7 + $0x70] sm:$0xff]  ;;  %v425_v9 = vld [vmem:[#allocation7 + $0xf8] sm:$0xff]  ;;  %v407_v10 = vld [vmem:[#allocation7 + $0x68] sm:$0xff] }
  0x3c   :  { %313 = vmatpush.msrb.mxu0 %v259_v21  ;;  %353 = vmatpush.msrb.mxu2 %v260_v22  ;;  %v424_v11 = vld [vmem:[#allocation7 + $0xf0] sm:$0xff]  ;;  %v423_v12 = vld [vmem:[#allocation7 + $0xe8] sm:$0xff]  ;;  %v406_v13 = vld [vmem:[#allocation7 + $0x60] sm:$0xff] }
  0x3d   :  { %333 = vmatpush.msrb.mxu1 %v291_v27  ;;  %373 = vmatpush.msrb.mxu3 %v292_v28  ;;  %v422_v14 = vld [vmem:[#allocation7 + $0xe0] sm:$0xff]  ;;  %v405_v15 = vld [vmem:[#allocation7 + $0x58] sm:$0xff]  ;;  %v404_v17 = vld [vmem:[#allocation7 + $0x50] sm:$0xff] }
  0x3e   :  { %314 = vmatpush.msrb.mxu0 %v257_v25  ;;  %354 = vmatpush.msrb.mxu2 %v258_v26  ;;  %v421_v16 = vld [vmem:[#allocation7 + $0xd8] sm:$0xff]  ;;  %v420_v18 = vld [vmem:[#allocation7 + $0xd0] sm:$0xff]  ;;  %v71_v19 = vld [vmem:[%s682_s5] sm:$0x3] }
  0x3f   :  { %334 = vmatpush.msrb.mxu1 %v289_v31  ;;  %374 = vmatpush.msrb.mxu3 %v290_v32  ;;  %v403_v20 = vld [vmem:[#allocation7 + $0x48] sm:$0xff]  ;;  %v402_v22 = vld [vmem:[#allocation7 + $0x40] sm:$0xff]  ;;  %v149_v23 = vperm.slane %v71_v19, 0  ;;  %v401_v25 = vld [vmem:[#allocation7 + $0x38] sm:$0xff]  ;;  %v150_v28 = vperm.slane %v71_v19, 1 }
  0x40   :  { %315 = vmatpush.msrb.mxu0 %v255_v29  ;;  %355 = vmatpush.msrb.mxu2 %v256_v30  ;;  %v419_v21 = vld [vmem:[#allocation7 + $0xc8] sm:$0xff]  ;;  %v400_v26 = vld [vmem:[#allocation7 + $0x30] sm:$0xff] }
  0x41   :  { %335 = vmatpush.msrb.mxu1 %v287_v35  ;;  %375 = vmatpush.msrb.mxu3 %v288_v36  ;;  %v396_v45 = vld [vmem:[#allocation7 + $0x10] sm:$0xff] }
  0x42   :  { %316 = vmatpush.msrb.mxu0 %v253_v33  ;;  %356 = vmatpush.msrb.mxu2 %v254_v34 }
  0x43   :  { %336 = vmatpush.msrb.mxu1 %v285_v39  ;;  %376 = vmatpush.msrb.mxu3 %v286_v40  ;;  %v399_v39 = vld [vmem:[#allocation7 + $0x28] sm:$0xff]  ;;  %v418_v40 = vld [vmem:[#allocation7 + $0xc0] sm:$0xff] }
  0x44   :  { %317 = vmatpush.msrb.mxu0 %v251_v37  ;;  %357 = vmatpush.msrb.mxu2 %v252_v38 }
  0x45   :  { %337 = vmatpush.msrb.mxu1 %v283_v50  ;;  %377 = vmatpush.msrb.mxu3 %v284_v52  ;;  %v413_v50 = vld [vmem:[#allocation7 + $0x98] sm:$0xff]  ;;  %v411_v52 = vld [vmem:[#allocation7 + $0x88] sm:$0xff] }
  0x46   :  { %318 = vmatpush.msrb.mxu0 %v249_v41  ;;  %358 = vmatpush.msrb.mxu2 %v250_v42  ;;  %v398_v41 = vld [vmem:[#allocation7 + $0x20] sm:$0xff]  ;;  %v417_v42 = vld [vmem:[#allocation7 + $0xb8] sm:$0xff] }
  0x47   :  { %338 = vmatpush.msrb.mxu1 %v281_v54  ;;  %378 = vmatpush.msrb.mxu3 %v282_v56  ;;  %v72_v54 = vld [vmem:[%s682_s5 + $0x2] sm:$0x3] }
  0x48   :  { %319 = vmatpush.msrb.mxu0 %v247_v43  ;;  %359 = vmatpush.msrb.mxu2 %v248_v44  ;;  %v397_v43 = vld [vmem:[#allocation7 + $0x18] sm:$0xff]  ;;  %v416_v44 = vld [vmem:[#allocation7 + $0xb0] sm:$0xff] }
  0x49   :  { %339 = vmatpush.msrb.mxu1 %v279_v58  ;;  %379 = vmatpush.msrb.mxu3 %v280_v60  ;;  %v305_v60 = vperm.slane %v72_v54, 1 }
  0x4a   :  { %320 = vmatpush.msrb.mxu0 %v245_v49  ;;  %360 = vmatpush.msrb.mxu2 %v246_v51  ;;  %v394_v49 = vld [vmem:[#allocation7] sm:$0xff]  ;;  %v412_v51 = vld [vmem:[#allocation7 + $0x90] sm:$0xff] }
  0x4b   :  { %340 = vmatpush.msrb.mxu1 %v277_v62  ;;  %380 = vmatpush.msrb.mxu3 %v278_v0 }
  0x4c   :  { %321 = vmatpush.msrb.mxu0 %v243_v53  ;;  %361 = vmatpush.msrb.mxu2 %v244_v55  ;;  %v410_v53 = vld [vmem:[#allocation7 + $0x80] sm:$0xff]  ;;  %v304_v55 = vperm.slane %v72_v54, 0 }
  0x4d   :  { %341 = vmatpush.msrb.mxu1 %v275_v1  ;;  %381 = vmatpush.msrb.mxu3 %v276_v2 }
  0x4e   :  { %322 = vmatpush.msrb.mxu0 %v241_v57  ;;  %362 = vmatpush.msrb.mxu2 %v242_v59 }
  0x4f   :  { %342 = vmatpush.msrb.mxu1 %v273_v3  ;;  %382 = vmatpush.msrb.mxu3 %v274_v4 }
  0x50   :  { %323 = vmatpush.msrb.mxu0 %v239_v61  ;;  %363 = vmatpush.msrb.mxu2 %v240_v63 }
  0x51   :  { %343 = vmatpush.msrb.mxu1 %v271_v5  ;;  %383 = vmatpush.msrb.mxu3 %v272_v6  ;;  %v502_v5 = vld [vmem:[%s682_s5 + $0x4] ss:$0 sm:$0xff] }
  0x52   :  { %429 = vmatpush.msra.mxu0 %v409_v7 }
  0x54   :  { %430 = vmatpush.msra.mxu0 %v408_v8 }
  0x56   :  { %431 = vmatpush.msra.mxu0 %v407_v10 }
  0x58   :  { %432 = vmatpush.msra.mxu0 %v406_v13 }
  0x5a   :  { %433 = vmatpush.msra.mxu0 %v405_v15 }
  0x5c   :  { %434 = vmatpush.msra.mxu0 %v404_v17 }
  0x5e   :  { %435 = vmatpush.msra.mxu0 %v403_v20 }
  0x60   :  { %436 = vmatpush.msra.mxu0 %v402_v22 }
  0x62   :  { %437 = vmatpush.msra.mxu0 %v401_v25 }
  0x64   :  { %438 = vmatpush.msra.mxu0 %v400_v26 }
  0x66   :  { %439 = vmatpush.msra.mxu0 %v399_v39 }
  0x68   :  { %440 = vmatpush.msra.mxu0 %v398_v41 }
  0x6a   :  { %441 = vmatpush.msra.mxu0 %v397_v43 }
  0x6c   :  { %442 = vmatpush.msra.mxu0 %v396_v45 }
  0x83   :  { %v79_v47 = vpop.permute.xlu0 %78 }
  0x84   :  { %vm80_vm0 = vcmp.eq.s32.totalorder %v75_v46, %v79_v47  ;;  %v415_v46 = vld [vmem:[#allocation7 + $0xa8] sm:$0xff] }
  0x85   :  { %489 = vmatmul.msk.f32.vlgmr.msra.gmra.mxu1 %vm80_vm0, %v613_v48  ;;  %490 = vmatmul.msk.f32.vlgmr.msra.gmra.mxu3 %vm80_vm0, %v613_v48  ;;  %v395_v47 = vld [vmem:[#allocation7 + $0x8] sm:$0xff]  ;;  %v414_v48 = vld [vmem:[#allocation7 + $0xa0] sm:$0xff] }
  0x86   :  { %449 = vmatpush.msra.mxu1 %v425_v9  ;;  %443 = vmatpush.msra.mxu0 %v395_v47 }
  0x88   :  { %450 = vmatpush.msra.mxu1 %v424_v11  ;;  %444 = vmatpush.msra.mxu0 %v394_v49 }
  0x8a   :  { %451 = vmatpush.msra.mxu1 %v423_v12 }
  0x8c   :  { %452 = vmatpush.msra.mxu1 %v422_v14 }
  0x8e   :  { %453 = vmatpush.msra.mxu1 %v421_v16 }
  0x90   :  { %454 = vmatpush.msra.mxu1 %v420_v18 }
  0x92   :  { %455 = vmatpush.msra.mxu1 %v419_v21 }
  0x94   :  { %456 = vmatpush.msra.mxu1 %v418_v40 }
  0x96   :  { %457 = vmatpush.msra.mxu1 %v417_v42 }
  0x98   :  { %458 = vmatpush.msra.mxu1 %v416_v44 }
  0x9a   :  { %459 = vmatpush.msra.mxu1 %v415_v46 }
  0x9c   :  { %460 = vmatpush.msra.mxu1 %v414_v48 }
  0x9e   :  { %461 = vmatpush.msra.mxu1 %v413_v50 }
  0xa0   :  { %462 = vmatpush.msra.mxu1 %v412_v51 }
  0xa2   :  { %463 = vmatpush.msra.mxu1 %v411_v52 }
  0xa4   :  { %464 = vmatpush.msra.mxu1 %v410_v53 }
  0xad   :  { %v170_v24 = vpop.f32.mrf.mxu0 }
  0xae   :  { %v171_v27 = vadd.f32 %v170_v24, %v149_v23 }
  0xb3   :  { %v210_v30 = vpop.f32.mrf.mxu2 }
  0xb4   :  { %v211_v33 = vadd.f32 %v210_v30, %v150_v28 }
 0x102   :  { %v190_v29 = vpop.f32.mrf.mxu1 }
 0x103   :  { %v191_v31 = vadd.f32 %v190_v29, %v171_v27 }
 0x105   :  { %v235_v32 = vmul.f32 0.2, %v191_v31  ;;  %vm233_vm1 = vcmp.ge.f32.partialorder %v191_v31, 0.0 }
 0x107   :  { %v237_v34 = vsel %vm233_vm1, %v191_v31, %v235_v32 }
 0x108   :  { %v230_v35 = vpop.f32.mrf.mxu3  ;;  %324 = vmatmul.f32.vlgmr.msrb.gmra.mxu0 %v237_v34  ;;  %364 = vmatmul.f32.vlgmr.msrb.gmra.mxu2 %v237_v34 }
 0x109   :  { %v231_v36 = vadd.f32 %v230_v35, %v211_v33 }
 0x10b   :  { %v236_v37 = vmul.f32 0.2, %v231_v36  ;;  %vm234_vm2 = vcmp.ge.f32.partialorder %v231_v36, 0.0 }
 0x10d   :  { %v238_v38 = vsel %vm234_vm2, %v231_v36, %v236_v37 }
 0x10e   :  { %344 = vmatmul.f32.vlgmr.msrb.gmra.mxu1 %v238_v38  ;;  %384 = vmatmul.f32.vlgmr.msrb.gmra.mxu3 %v238_v38 }
 0x185   :  { %v325_v56 = vpop.f32.mrf.mxu0 }
 0x186   :  { %v326_v57 = vadd.f32 %v325_v56, %v304_v55 }
 0x18b   :  { %v345_v58 = vpop.f32.mrf.mxu1  ;;  %v365_v61 = vpop.f32.mrf.mxu2 }
 0x18c   :  { %v346_v59 = vadd.f32 %v345_v58, %v326_v57  ;;  %v366_v63 = vadd.f32 %v365_v61, %v305_v60 }
 0x18e   :  { %vm388_vm3 = vcmp.ge.f32.partialorder %v346_v59, 0.0  ;;  %v390_v62 = vmul.f32 0.2, %v346_v59 }
 0x190   :  { %v392_v0 = vsel %vm388_vm3, %v346_v59, %v390_v62 }
 0x191   :  { %v385_v1 = vpop.f32.mrf.mxu3  ;;  %445 = vmatmul.f32.vlgmr.msra.gmra.mxu0 %v392_v0 }
 0x192   :  { %v386_v2 = vadd.f32 %v385_v1, %v366_v63 }
 0x194   :  { %vm389_vm4 = vcmp.ge.f32.partialorder %v386_v2, 0.0  ;;  %v391_v3 = vmul.f32 0.2, %v386_v2 }
 0x196   :  { %v393_v4 = vsel %vm389_vm4, %v386_v2, %v391_v3 }
 0x197   :  { %465 = vmatmul.f32.vlgmr.msra.gmra.mxu1 %v393_v4 }
 0x20e   :  { %v446_v6 = vpop.f32.mrf.mxu0 }
 0x20f   :  { %v447_v7 = vadd.f32 %v502_v5, %v446_v6 }
 0x214   :  { %v466_v8 = vpop.f32.mrf.mxu1 }
 0x215   :  { %v467_v9 = vadd.f32 %v466_v8, %v447_v7 }
 0x217   :  { %469 = vst [vmem:[#allocation8] sm:$0xff] %v467_v9 }
 0x218   :  { %480 = dma.vmem_to_hbm [thread:$0]  %s476_s22, 128, %s478_s25, [#allocation4]  }
 0x219   :  { %603 = dma.done.wait [#allocation4], 128  }
 0x21a   :  { %604 = vsyncadd [#allocation4], 4294967168 }
 0x21b   :  { %485 = vsyncpa [#allocation3], 1 }
 0x21c   :  { %486 = vsyncpa [#allocation6], 1 }
 0x21d   :  { %487 = vsyncpa [#allocation4], 1 }

</bundles_post_ra>
